<compile_context>
chip_gen: v7x
topology: tpu7x:2x2x1
jax: 0.10.0
libtpu: 0.0.40
codegen_flags: <defaults>
</compile_context>

<pallas_src>
import functools

import jax
import jax.numpy as jnp
from jax.experimental import pallas as pl
from jax.experimental.pallas import tpu as pltpu

LN_EPS = 1e-5


def weighted_add_kernel(t_ref, gamma_ref, beta_eff_ref, w_ref, o_ref, *, d_true):
    # t_ref:        (TB, C, D)  input block (full-extent C and D -> no padding)
    # gamma_ref:    (1, D)      LayerNorm weight
    # beta_eff_ref: (1, D)      LayerNorm bias * sum(w)
    # w_ref:        (1, C, 1)   per-channel mixing weight
    # o_ref:        (TB, D)
    t = t_ref[...].astype(jnp.float32)
    inv_d = 1.0 / d_true

    # --- fused one-pass LayerNorm statistics over the last dim -------------
    mean = jnp.sum(t, axis=-1, keepdims=True) * inv_d
    mean_sq = jnp.sum(t * t, axis=-1, keepdims=True) * inv_d
    var = mean_sq - mean * mean
    xn = (t - mean) * jax.lax.rsqrt(var + LN_EPS)          # (TB, C, D)

    # --- channel-weighted reduce first; gamma/beta applied once on (TB, D) --
    reduced = jnp.sum(xn * w_ref[...], axis=1)              # (TB, D)
    o_ref[...] = (reduced * gamma_ref[...] + beta_eff_ref[...]).astype(o_ref.dtype)


def _choose_batch_tile(B, C, D, itemsize):
    """Pick the batch tile size from a VMEM-accurate per-row footprint."""
    pack = {1: 32, 2: 16, 4: 8}.get(itemsize, 8)   # sublane packing of input dtype
    c_in_phys = -(-C // pack) * pack               # C is sublane-padded in VMEM
    c_f32_phys = -(-C // 8) * 8                    # f32 temporaries pack at 8
    d_phys = -(-D // 128) * 128                    # lane padding of the minor dim

    in_row = c_in_phys * d_phys * itemsize          # one input-block batch row
    tmp_row = 3 * c_f32_phys * d_phys * 4           # ~3 live f32 temps (t/centered/xn)
    out_row = 2 * d_phys * 4                        # double-buffered output row (f32-acct)
    bytes_per_row = 2 * in_row + tmp_row + out_row  # 2x: input auto double-buffer
    budget = 24 << 20                               # fits v5e/v6e/v7x w/ headroom

    tb = max(pack, (budget // bytes_per_row) // pack * pack)
    if tb >= B:
        if B >= 2 * pack:
            # Split in two blocks so the "parallel" axis shards across both
            # v7x TensorCores; round up to the sublane packing.
            tb = (-(-B // (2 * pack))) * pack
        else:
            tb = B                                  # full-extent block (tiny B)
    else:
        # Keep >= 4 grid steps for DMA/compute overlap once rows are plentiful.
        while (B + tb - 1) // tb < 4 and tb > 8 * pack:
            tb = (tb // 2 // pack) * pack
    return tb


def weighted_add(t, gamma, beta, w):
    """t: (B, C, D); gamma/beta: (D,); w: (C, 1) -> (B, D)."""
    B, C, D = t.shape
    itemsize = jnp.dtype(t.dtype).itemsize
    tb = _choose_batch_tile(B, C, D, itemsize)
    grid = (pl.cdiv(B, tb),)

    gamma2 = gamma.astype(jnp.float32).reshape(1, D)
    beta_eff = (beta * jnp.sum(w)).astype(jnp.float32).reshape(1, D)
    w3 = w.reshape(1, C, 1).astype(jnp.float32)

    out = pl.pallas_call(
        functools.partial(weighted_add_kernel, d_true=D),
        out_shape=jax.ShapeDtypeStruct((B, D), t.dtype),
        grid=grid,
        in_specs=[
            pl.BlockSpec((tb, C, D), lambda i: (i, 0, 0)),   # full C, D: no pad
            pl.BlockSpec((1, D), lambda i: (0, 0)),
            pl.BlockSpec((1, D), lambda i: (0, 0)),
            pl.BlockSpec((1, C, 1), lambda i: (0, 0, 0)),
        ],
        out_specs=pl.BlockSpec((tb, D), lambda i: (i, 0)),
        compiler_params=pltpu.CompilerParams(
            dimension_semantics=("parallel",),
            vmem_limit_bytes=40 << 20,   # safe on v5e/v6e (128 MiB) and v7x (64 MiB/TC)
        ),
    )(t, gamma2, beta_eff, w3)

    return out


def weighted_add_ref(t, gamma, beta, w):
    """Pure-JAX reference mirroring the PyTorch forward."""
    mean = jnp.mean(t, axis=-1, keepdims=True)
    var = jnp.mean((t - mean) ** 2, axis=-1, keepdims=True)
    y = (t - mean) / jnp.sqrt(var + LN_EPS) * gamma + beta
    return jnp.sum(y * w.reshape(1, -1, 1), axis=1)


if __name__ == "__main__":
    # Small shapes consistent with the module: batch=2, channel=4, in_dim=32
    B, C, D = 2, 4, 32
    key = jax.random.PRNGKey(0)
    t = jax.random.normal(key, (B, C, D), dtype=jnp.float32)

    # Deterministic parameter init matching nn.Module.__init__:
    #   LayerNorm: weight=ones(D), bias=zeros(D);  w = ones(C, 1)
    gamma = jnp.ones((D,), dtype=jnp.float32)
    beta = jnp.zeros((D,), dtype=jnp.float32)
    w = jnp.ones((C, 1), dtype=jnp.float32)

    out = weighted_add(t, gamma, beta, w)
    out = jax.block_until_ready(out)

    ref = weighted_add_ref(t, gamma, beta, w)
    assert out.shape == (B, D)
    assert jnp.allclose(out, ref, atol=1e-5, rtol=1e-5), "mismatch vs reference"

    print("KERNEL_OK")
</pallas_src>

<mosaic_0001>
module attributes {stable_mosaic.version = 11 : i64} {
  func.func @weighted_add_kernel(%arg0: i32, %arg1: memref<2x4x32xf32, #tpu.memory_space<vmem>>, %arg2: memref<1x32xf32, #tpu.memory_space<vmem>>, %arg3: memref<1x32xf32, #tpu.memory_space<vmem>>, %arg4: memref<1x4x1xf32, #tpu.memory_space<vmem>>, %arg5: memref<2x32xf32, #tpu.memory_space<vmem>>) attributes {dimension_semantics = [#tpu.dimension_semantics<parallel>], iteration_bounds = array<i64: 1>, scalar_prefetch = 0 : i64, scratch_operands = 0 : i64, tpu.core_type = #tpu.core_type<tc>, window_params = [{transform_indices = @transform_0, window_bounds = array<i64: 2, 4, 32>}, {pipeline_mode = #tpu.pipeline_mode<synchronous>, transform_indices = @transform_1, window_bounds = array<i64: 1, 32>}, {pipeline_mode = #tpu.pipeline_mode<synchronous>, transform_indices = @transform_2, window_bounds = array<i64: 1, 32>}, {pipeline_mode = #tpu.pipeline_mode<synchronous>, transform_indices = @transform_3, window_bounds = array<i64: 1, 4, 1>}, {transform_indices = @transform_4, window_bounds = array<i64: 2, 32>}]} {
    %c0 = arith.constant 0 : index
    %c0_0 = arith.constant 0 : index
    %c0_1 = arith.constant 0 : index
    %0 = vector.load %arg1[%c0, %c0_0, %c0_1] : memref<2x4x32xf32, #tpu.memory_space<vmem>>, vector<2x4x32xf32>
    %cst = arith.constant dense<0.000000e+00> : vector<2x4xf32>
    %1 = vector.multi_reduction <add>, %0, %cst [2] : vector<2x4x32xf32> to vector<2x4xf32>
    %2 = vector.shape_cast %1 : vector<2x4xf32> to vector<2x4x1xf32>
    %cst_2 = arith.constant 3.125000e-02 : f32
    %3 = vector.broadcast %cst_2 : f32 to vector<2x4x1xf32>
    %4 = arith.mulf %2, %3 : vector<2x4x1xf32>
    %5 = arith.mulf %0, %0 : vector<2x4x32xf32>
    %cst_3 = arith.constant dense<0.000000e+00> : vector<2x4xf32>
    %6 = vector.multi_reduction <add>, %5, %cst_3 [2] : vector<2x4x32xf32> to vector<2x4xf32>
    %7 = vector.shape_cast %6 : vector<2x4xf32> to vector<2x4x1xf32>
    %cst_4 = arith.constant 3.125000e-02 : f32
    %8 = vector.broadcast %cst_4 : f32 to vector<2x4x1xf32>
    %9 = arith.mulf %7, %8 : vector<2x4x1xf32>
    %10 = arith.mulf %4, %4 : vector<2x4x1xf32>
    %11 = arith.subf %9, %10 : vector<2x4x1xf32>
    %12 = vector.broadcast %4 : vector<2x4x1xf32> to vector<2x4x32xf32>
    %13 = arith.subf %0, %12 : vector<2x4x32xf32>
    %cst_5 = arith.constant 9.99999974E-6 : f32
    %14 = vector.broadcast %cst_5 : f32 to vector<2x4x1xf32>
    %15 = arith.addf %11, %14 : vector<2x4x1xf32>
    %16 = math.rsqrt %15 : vector<2x4x1xf32>
    %17 = vector.broadcast %16 : vector<2x4x1xf32> to vector<2x4x32xf32>
    %18 = arith.mulf %13, %17 : vector<2x4x32xf32>
    %c0_6 = arith.constant 0 : index
    %c0_7 = arith.constant 0 : index
    %c0_8 = arith.constant 0 : index
    %19 = vector.load %arg4[%c0_6, %c0_7, %c0_8] : memref<1x4x1xf32, #tpu.memory_space<vmem>>, vector<1x4x1xf32>
    %20 = vector.broadcast %19 : vector<1x4x1xf32> to vector<2x4x32xf32>
    %21 = arith.mulf %18, %20 : vector<2x4x32xf32>
    %cst_9 = arith.constant dense<0.000000e+00> : vector<2x32xf32>
    %22 = vector.multi_reduction <add>, %21, %cst_9 [1] : vector<2x4x32xf32> to vector<2x32xf32>
    %c0_10 = arith.constant 0 : index
    %c0_11 = arith.constant 0 : index
    %23 = vector.load %arg2[%c0_10, %c0_11] : memref<1x32xf32, #tpu.memory_space<vmem>>, vector<1x32xf32>
    %24 = vector.broadcast %23 : vector<1x32xf32> to vector<2x32xf32>
    %25 = arith.mulf %22, %24 : vector<2x32xf32>
    %c0_12 = arith.constant 0 : index
    %c0_13 = arith.constant 0 : index
    %26 = vector.load %arg3[%c0_12, %c0_13] : memref<1x32xf32, #tpu.memory_space<vmem>>, vector<1x32xf32>
    %27 = vector.broadcast %26 : vector<1x32xf32> to vector<2x32xf32>
    %28 = arith.addf %25, %27 : vector<2x32xf32>
    %c0_14 = arith.constant 0 : index
    %c0_15 = arith.constant 0 : index
    %29 = vector.load %arg5[%c0_14, %c0_15] : memref<2x32xf32, #tpu.memory_space<vmem>>, vector<2x32xf32>
    tpu.vector_store %arg5[%c0_14, %c0_15], %28 {strides = array<i32>} : memref<2x32xf32, #tpu.memory_space<vmem>>, vector<2x32xf32>,
    return
  }
  func.func @transform_0(%arg0: i32) -> (i32, i32, i32) {
    %c0_i32 = arith.constant 0 : i32
    %c0_i32_0 = arith.constant 0 : i32
    %c0_i32_1 = arith.constant 0 : i32
    return %arg0, %c0_i32, %c0_i32_0 : i32, i32, i32
  }
  func.func @transform_1(%arg0: i32) -> (i32, i32) {
    %c0_i32 = arith.constant 0 : i32
    %c0_i32_0 = arith.constant 0 : i32
    %c0_i32_1 = arith.constant 0 : i32
    return %c0_i32, %c0_i32_0 : i32, i32
  }
  func.func @transform_2(%arg0: i32) -> (i32, i32) {
    %c0_i32 = arith.constant 0 : i32
    %c0_i32_0 = arith.constant 0 : i32
    %c0_i32_1 = arith.constant 0 : i32
    return %c0_i32, %c0_i32_0 : i32, i32
  }
  func.func @transform_3(%arg0: i32) -> (i32, i32, i32) {
    %c0_i32 = arith.constant 0 : i32
    %c0_i32_0 = arith.constant 0 : i32
    %c0_i32_1 = arith.constant 0 : i32
    %c0_i32_2 = arith.constant 0 : i32
    return %c0_i32, %c0_i32_0, %c0_i32_1 : i32, i32, i32
  }
  func.func @transform_4(%arg0: i32) -> (i32, i32) {
    %c0_i32 = arith.constant 0 : i32
    %c0_i32_0 = arith.constant 0 : i32
    return %arg0, %c0_i32 : i32, i32
  }
}

</mosaic_0001>

<bundles_post_ra>
// kernel: tpu_custom_call.1
= control target key start
LH: loop header
LB: loop body
LE: loop exit
PB: predicated region body
PF: predicated region fallthrough
CT: control target
= control target key end

     0   :  { %9 = vsyncpa [#allocation3], 0  ;;  %s257_s0 = inlined_call_operand.hbm [shape: f32[2,4,32], index: 0, kind: input, shape index: {}]   ;;  %s258_s1 = inlined_call_operand.vmem [shape: f32[1,32], index: 1, kind: input, shape index: {}]   ;;  %s259_s2 = inlined_call_operand.vmem [shape: f32[1,32], index: 2, kind: input, shape index: {}]   ;;  %s260_s3 = inlined_call_operand.vmem [shape: f32[1,4,1], index: 3, kind: input, shape index: {}]   ;;  %s261_s4 = inlined_call_operand.hbm [shape: f32[2,32], index: 4, kind: output, shape index: {}]  }
   0x1   :  { %10 = vsyncpa [#allocation4], 0  ;;  %s188_s15 = smov [#allocation2]   ;;  %s140_s19 = scalar_lea.hbm %s257_s0, 128 }
   0x2   :  { %s16_s16 = sshll.u32 %s188_s15, 4  ;;  %p141_p0 = scmp.ne.s32.totalorder %s257_s0, %s140_s19  ;;  %s17_s16 = int_to_ptr.vmem [resolvable:$true] %s16_s16 }
   0x3   :  { %p144_p1 = scmp.lt.u32.totalorder %s140_s19, %s257_s0 }
   0x5   :  { %p146_p2 = pnand %p144_p1, %p141_p0 }
   0x7   :  { %149 = shalt.err (!%p146_p2)
}
   0x8   :  { %s150_s24 = scalar_lea.vmem %s17_s16, 128  ;;  %p155_p4 = scmp.lt.s32.totalorder %s17_s16, %s17_s16 }
   0x9   :  { %p151_p3 = scmp.ne.s32.totalorder %s17_s16, %s150_s24  ;;  %p156_p5 = scmp.lt.s32.totalorder %s150_s24, %s150_s24 }
   0xb   :  { %p157_p6 = por %p156_p5, %p155_p4 }
   0xd   :  { %p158_p7 = pnand %p157_p6, %p151_p3 }
   0xf   :  { %161 = shalt.err (!%p158_p7)
}
  0x10   :  { %s189_s25 = smov 64   ;;  %s190_s26 = smov 4  }
  0x11   :  { %22 = dma.hbm_to_vmem [thread:$0]  %s257_s0, 128, %s17_s16, [#allocation3], %s189_s25, %s189_s25, %s190_s26  }
  0x12   :  { %184 = dma.done.wait [#allocation3], 128  }
  0x13   :  { %185 = vsyncadd [#allocation3], 4294967168  ;;  %v191_v0 = vmov 0   ;;  %vm34_vm0 = vcmask 257024   ;;  %v33_v1 = vld [vmem:[#allocation2 + $0x4] sm:$0xf] }
  0x14   :  { %135 = vset.pattern.permute.xlu0 %v191_v0  ;;  %v32_v2 = vld [vmem:[#allocation2] sm:$0xf]  ;;  %v38_v3 = vsel %vm34_vm0, %v33_v1, 0.0  ;;  %v44_v4 = vmul.f32 %v33_v1, %v33_v1  ;;  %s192_s7 = smov [#allocation5]   ;;  %vm108_vm1 = vcmask 1041409   ;;  %vm111_vm2 = vcmask 254976  }
  0x15   :  { %v43_v5 = vmul.f32 %v32_v2, %v32_v2  ;;  %39 = vadd.xlane.f32.xlu0 %v38_v3  ;;  %v35_v7 = vsel %vm34_vm0, %v32_v2, 0.0  ;;  %v65_v9 = vld [vmem:[%s260_s3] sm:$0xf]  ;;  %s119_s8 = sshll.u32 %s192_s7, 4  ;;  %s120_s8 = int_to_ptr.vmem [resolvable:$true] %s119_s8 }
  0x16   :  { %v48_v6 = vsel %vm34_vm0, %v44_v4, 0.0  ;;  %v128_v43 = vld [vmem:[%s258_s1] ss:$0 sm:$0xff]  ;;  %s162_s1 = scalar_lea.vmem %s120_s8, 32  ;;  %p167_p9 = scmp.lt.s32.totalorder %s120_s8, %s120_s8 }
  0x17   :  { %49 = vadd.xlane.f32.xlu1 %v48_v6  ;;  %v45_v8 = vsel %vm34_vm0, %v43_v5, 0.0  ;;  %v129_v46 = vld [vmem:[%s259_s2] ss:$0 sm:$0xff]  ;;  %p163_p8 = scmp.ne.s32.totalorder %s120_s8, %s162_s1  ;;  %p168_p10 = scmp.lt.s32.totalorder %s162_s1, %s162_s1 }
  0x19   :  { %36 = vadd.xlane.f32.xlu0 %v35_v7  ;;  %p169_p11 = por %p168_p10, %p167_p9 }
  0x1b   :  { %46 = vadd.xlane.f32.xlu1 %v45_v8  ;;  %p170_p12 = pnand %p169_p11, %p163_p8 }
  0x2f   :  { %68 = vperm.xlu0 %135, %v65_v9  }
  0xa2   :  { %v40_v10 = vpop.xlane.xlu0 %39 }
  0xa3   :  { %v42_v11 = vmul.f32 0.03125, %v40_v10 }
  0xa4   :  { %v50_v12 = vpop.xlane.xlu1 %49 }
  0xa5   :  { %v54_v13 = vmul.f32 %v42_v11, %v42_v11  ;;  %v52_v14 = vmul.f32 0.03125, %v50_v12  ;;  %v58_v24 = vsub.f32 %v33_v1, %v42_v11 }
  0xa6   :  { %v37_v15 = vpop.xlane.xlu0 %36 }
  0xa7   :  { %v56_v16 = vsub.f32 %v52_v14, %v54_v13  ;;  %v41_v17 = vmul.f32 0.03125, %v37_v15 }
  0xa8   :  { %v47_v18 = vpop.xlane.xlu1 %46 }
  0xa9   :  { %v60_v19 = vadd.f32 1e-05, %v56_v16  ;;  %v53_v20 = vmul.f32 %v41_v17, %v41_v17  ;;  %v51_v21 = vmul.f32 0.03125, %v47_v18  ;;  %v57_v28 = vsub.f32 %v32_v2, %v41_v17 }
  0xab   :  { %136 = vrsqrt.f32 %v60_v19  ;;  %v55_v22 = vsub.f32 %v51_v21, %v53_v20 }
  0xad   :  { %v59_v23 = vadd.f32 1e-05, %v55_v22 }
  0xae   :  { %v69_v26 = vpop.permute.xlu0 %68 }
  0xaf   :  { %138 = vrsqrt.f32 %v59_v23 }
  0xb5   :  { %v137_v25 = vpop.eup %136 }
  0xb6   :  { %v64_v27 = vmul.f32 %v137_v25, %v58_v24 }
  0xb8   :  { %v72_v29 = vmul.f32 %v69_v26, %v64_v27 }
  0xb9   :  { %v139_v30 = vpop.eup %138 }
  0xba   :  { %v63_v31 = vmul.f32 %v139_v30, %v57_v28  ;;  %v80_v32 = vsel %vm34_vm0, %v72_v29, 0.0 }
  0xbb   :  { %v81_v33 = vrot.slane %v80_v32, 4 }
  0xbc   :  { %v71_v34 = vmul.f32 %v69_v26, %v63_v31 }
  0xbd   :  { %v82_v35 = vadd.f32 %v81_v33, %v80_v32 }
  0xbe   :  { %v73_v36 = vsel %vm34_vm0, %v71_v34, 0.0 }
  0xbf   :  { %v74_v37 = vrot.slane %v73_v36, 4  ;;  %v83_v38 = vrot.slane %v82_v35, 2 }
  0xc1   :  { %v75_v39 = vadd.f32 %v74_v37, %v73_v36  ;;  %v84_v40 = vadd.f32 %v83_v38, %v82_v35 }
  0xc3   :  { %v76_v41 = vrot.slane %v75_v39, 2  ;;  %v85_v42 = vrot.slane %v84_v40, 1 }
  0xc5   :  { %v77_v44 = vadd.f32 %v76_v41, %v75_v39  ;;  %v86_v45 = vadd.f32 %v85_v42, %v84_v40 }
  0xc7   :  { %v78_v47 = vrot.slane %v77_v44, 1  ;;  %v95_v48 = vmul.f32 %v128_v43, %v86_v45 }
  0xc9   :  { %v79_v49 = vadd.f32 %v78_v47, %v77_v44  ;;  %v104_v50 = vadd.f32 %v129_v46, %v95_v48 }
  0xcb   :  { %v94_v51 = vmul.f32 %v128_v43, %v79_v49  ;;  %v107_v53 = vrot.slane %v104_v50, 7 }
  0xcd   :  { %v103_v52 = vadd.f32 %v129_v46, %v94_v51 }
  0xcf   :  { %v109_v54 = vsel %vm108_vm1, %v107_v53, %v103_v52 }
  0xd0   :  { %112 = vst.msk [vmem:[#allocation5] sm:$0x3] %vm111_vm2, %v109_v54 }
  0xd1   :  { %173 = shalt.err (!%p170_p12)
}
  0xd2   :  { %s174_s10 = scalar_lea.hbm %s261_s4, 32 }
  0xd3   :  { %p175_p13 = scmp.ne.s32.totalorder %s261_s4, %s174_s10  ;;  %p178_p0 = scmp.lt.u32.totalorder %s174_s10, %s261_s4 }
  0xd5   :  { %p180_p1 = pnand %p178_p0, %p175_p13 }
  0xd7   :  { %183 = shalt.err (!%p180_p1)
}
  0xd8   :  { %122 = dma.vmem_to_hbm [thread:$0]  %s120_s8, 32, %s261_s4, [#allocation4]  }
  0xd9   :  { %186 = dma.done.wait [#allocation4], 32  }
  0xda   :  { %187 = vsyncadd [#allocation4], 4294967264 }
  0xdb   :  { %126 = vsyncpa [#allocation3], 1 }
  0xdc   :  { %127 = vsyncpa [#allocation4], 1 }

</bundles_post_ra>
